<compile_context>
chip_gen: v6e
topology: v6e:2x2x1
jax: 0.10.0
libtpu: 0.0.40
codegen_flags: <defaults>
</compile_context>

<pallas_src>
import jax
import jax.numpy as jnp
from jax import lax
from jax.experimental import pallas as pl
from jax.experimental.pallas import tpu as pltpu


def _round_up(n, m):
    return pl.cdiv(n, m) * m


def _make_mlp_kernel(chunk, n_chunks):
    """Fused 3-layer MLP on a (feat, tb) tile, iterated in `chunk`-lane pieces."""

    def kernel(x_ref, w1_ref, b1_ref, w2_ref, b2_ref, w3_ref, b3_ref, o_ref):
        # Tiny weights/biases: load once per grid step, held in vregs.
        w1 = w1_ref[...]          # (16, 2)
        b1 = b1_ref[...]          # (16, 1)
        w2 = w2_ref[...]          # (32, 16)
        b2 = b2_ref[...]          # (32, 1)
        w3 = w3_ref[...]          # (2, 32)
        b3 = b3_ref[...]          # (2, 1)

        def body(c, carry):
            off = pl.multiple_of(c * chunk, 128)
            xT = x_ref[:, pl.ds(off, chunk)]                               # (2, chunk)
            h1 = jnp.maximum(
                jnp.dot(w1, xT, preferred_element_type=jnp.float32) + b1, 0.0)   # (16, chunk)
            h2 = jnp.maximum(
                jnp.dot(w2, h1, preferred_element_type=jnp.float32) + b2, 0.0)   # (32, chunk)
            h3 = jnp.maximum(
                jnp.dot(w3, h2, preferred_element_type=jnp.float32) + b3, 0.0)   # (2, chunk)
            o_ref[:, pl.ds(off, chunk)] = h3.astype(o_ref.dtype)
            return carry

        if n_chunks == 1:
            body(0, 0)
        else:
            lax.fori_loop(0, n_chunks, body, 0, unroll=(n_chunks <= 8))

    return kernel


def generator_forward_t(xT, params, *, batch_tile=32768, chunk=512):
    """Channels-first entry point: xT is (2, B) float32, returns (2, B).

    No transpose plumbing -- this is the preferred layout for composing with
    surrounding channels-first ops (see perf review on x.T / out.T HBM cost).
    """
    Din, B = xT.shape
    assert Din == 2
    W1, b1 = params["W1"], params["b1"]   # (2,16),  (1,16)
    W2, b2 = params["W2"], params["b2"]   # (16,32), (1,32)
    W3, b3 = params["W3"], params["b3"]   # (32,2),  (1,2)
    Dout = W3.shape[1]

    # Pad only to a multiple of 128 lanes (never to a multiple of the tile).
    Bp = int(_round_up(B, 128))
    if Bp != B:
        xT = jnp.pad(xT, ((0, 0), (0, Bp - B)))

    # Lane tile: large (default 32K) to amortize per-step overhead, but capped
    # at ~half the (padded) batch so the grid has >= 2 steps for v7x megacore.
    tb = min(int(batch_tile), int(_round_up(pl.cdiv(Bp, 2), 128)))
    tb = int(_round_up(max(tb, 128), 128))
    grid = (pl.cdiv(Bp, tb),)   # ragged last block is masked by Pallas edge DMA

    # In-kernel chunk size: must be a multiple of 128 and divide tb.
    ck = next(c for c in (int(chunk), 512, 256, 128)
              if c >= 128 and c % 128 == 0 and c <= tb and tb % c == 0)
    n_chunks = tb // ck

    # Layout plumbing for parameters: (out, in) weights, column biases.
    W1T, W2T, W3T = W1.T, W2.T, W3.T
    b1c, b2c, b3c = b1.reshape(-1, 1), b2.reshape(-1, 1), b3.reshape(-1, 1)

    # Full-array blocks, constant block index => resident in VMEM, no re-DMA.
    def full(a):
        return pl.BlockSpec(a.shape, lambda i: (0,) * a.ndim)

    flops = 2 * Bp * (2 * 16 + 16 * 32 + 32 * 2)
    param_bytes = sum(int(a.size) * a.dtype.itemsize
                      for a in (W1T, b1c, W2T, b2c, W3T, b3c))
    bytes_accessed = Bp * (Din + Dout) * 4 + param_bytes

    out = pl.pallas_call(
        _make_mlp_kernel(ck, n_chunks),
        out_shape=jax.ShapeDtypeStruct((Dout, Bp), jnp.float32),
        grid_spec=pltpu.PrefetchScalarGridSpec(
            num_scalar_prefetch=0,
            grid=grid,
            in_specs=[
                pl.BlockSpec((Din, tb), lambda i: (0, i)),   # lane-dense x tile
                full(W1T), full(b1c),
                full(W2T), full(b2c),
                full(W3T), full(b3c),
            ],
            out_specs=pl.BlockSpec((Dout, tb), lambda i: (0, i)),  # lane-dense out
        ),
        compiler_params=pltpu.CompilerParams(
            dimension_semantics=("parallel",),   # shard steps across TCs (v7x)
        ),
        cost_estimate=pl.CostEstimate(
            flops=flops, transcendentals=0, bytes_accessed=bytes_accessed
        ),
    )(xT, W1T, b1c, W2T, b2c, W3T, b3c)

    if Bp != B:
        out = out[:, :B]
    return out


def generator_forward(x, params, *, batch_tile=32768):
    """PyTorch-facing layout: x is (B, 2), returns (B, 2).

    Note: x.T and the final .T are standalone XLA transposes (full HBM
    read+write each); use generator_forward_t in channels-first pipelines.
    """
    outT = generator_forward_t(x.T, params, batch_tile=batch_tile)
    return outT.T


def init_params(key):
    """Deterministic init mimicking PyTorch nn.Linear defaults:
    U(-1/sqrt(fan_in), 1/sqrt(fan_in)) for both weight and bias."""
    sizes = [(2, 16), (16, 32), (32, 2)]
    params = {}
    for idx, (fan_in, fan_out) in enumerate(sizes, start=1):
        key, kw, kb = jax.random.split(key, 3)
        bound = 1.0 / jnp.sqrt(jnp.float32(fan_in))
        params[f"W{idx}"] = jax.random.uniform(
            kw, (fan_in, fan_out), jnp.float32, minval=-bound, maxval=bound)
        params[f"b{idx}"] = jax.random.uniform(
            kb, (1, fan_out), jnp.float32, minval=-bound, maxval=bound)
    return params


def _reference(x, p):
    h = jnp.maximum(x @ p["W1"] + p["b1"], 0.0)
    h = jnp.maximum(h @ p["W2"] + p["b2"], 0.0)
    return jnp.maximum(h @ p["W3"] + p["b3"], 0.0)


if __name__ == "__main__":
    key = jax.random.PRNGKey(0)
    key, kx1, kx2, kx3 = jax.random.split(key, 4)
    params = init_params(key)

    # (1) 128-aligned batch, forced small tile -> multi-step grid (grid=(2,)).
    B1 = 256
    x1 = jax.random.normal(kx1, (B1, 2), jnp.float32)
    out1 = jax.block_until_ready(generator_forward(x1, params, batch_tile=128))
    assert out1.shape == (B1, 2)
    assert jnp.allclose(out1, _reference(x1, params), atol=1e-5, rtol=1e-5), \
        "mismatch (aligned batch)"

    # (2) Ragged batch (non-multiple of 128) -> 128-pad path, single step.
    B2 = 100
    x2 = jax.random.normal(kx2, (B2, 2), jnp.float32)
    out2 = jax.block_until_ready(generator_forward(x2, params))
    assert out2.shape == (B2, 2)
    assert jnp.allclose(out2, _reference(x2, params), atol=1e-5, rtol=1e-5), \
        "mismatch (ragged batch)"

    # (3) Channels-first entry, ragged last *block* + in-kernel chunk loop
    #     (B=640, tile=384 -> grid=(2,), last block masked; chunk=128 x 3).
    B3 = 640
    x3 = jax.random.normal(kx3, (B3, 2), jnp.float32)
    out3T = jax.block_until_ready(
        generator_forward_t(x3.T, params, batch_tile=512, chunk=128))
    assert out3T.shape == (2, B3)
    assert jnp.allclose(out3T.T, _reference(x3, params), atol=1e-5, rtol=1e-5), \
        "mismatch (channels-first / ragged block)"

    print("KERNEL_OK")
</pallas_src>

<mosaic_0001>
module attributes {stable_mosaic.version = 11 : i64} {
  func.func @kernel(%arg0: i32, %arg1: memref<2x128xf32, #tpu.memory_space<vmem>>, %arg2: memref<16x2xf32, #tpu.memory_space<vmem>>, %arg3: memref<16x1xf32, #tpu.memory_space<vmem>>, %arg4: memref<32x16xf32, #tpu.memory_space<vmem>>, %arg5: memref<32x1xf32, #tpu.memory_space<vmem>>, %arg6: memref<2x32xf32, #tpu.memory_space<vmem>>, %arg7: memref<2x1xf32, #tpu.memory_space<vmem>>, %arg8: memref<2x128xf32, #tpu.memory_space<vmem>>) attributes {dimension_semantics = [#tpu.dimension_semantics<parallel>], iteration_bounds = array<i64: 2>, scalar_prefetch = 0 : i64, scratch_operands = 0 : i64, tpu.core_type = #tpu.core_type<tc>, window_params = [{transform_indices = @transform_0, window_bounds = array<i64: 2, 128>}, {pipeline_mode = #tpu.pipeline_mode<synchronous>, transform_indices = @transform_1, window_bounds = array<i64: 16, 2>}, {pipeline_mode = #tpu.pipeline_mode<synchronous>, transform_indices = @transform_2, window_bounds = array<i64: 16, 1>}, {pipeline_mode = #tpu.pipeline_mode<synchronous>, transform_indices = @transform_3, window_bounds = array<i64: 32, 16>}, {pipeline_mode = #tpu.pipeline_mode<synchronous>, transform_indices = @transform_4, window_bounds = array<i64: 32, 1>}, {pipeline_mode = #tpu.pipeline_mode<synchronous>, transform_indices = @transform_5, window_bounds = array<i64: 2, 32>}, {pipeline_mode = #tpu.pipeline_mode<synchronous>, transform_indices = @transform_6, window_bounds = array<i64: 2, 1>}, {transform_indices = @transform_7, window_bounds = array<i64: 2, 128>}]} {
    %c0 = arith.constant 0 : index
    %c0_0 = arith.constant 0 : index
    %0 = vector.load %arg2[%c0, %c0_0] : memref<16x2xf32, #tpu.memory_space<vmem>>, vector<16x2xf32>
    %c0_1 = arith.constant 0 : index
    %c0_2 = arith.constant 0 : index
    %1 = vector.load %arg3[%c0_1, %c0_2] : memref<16x1xf32, #tpu.memory_space<vmem>>, vector<16x1xf32>
    %c0_3 = arith.constant 0 : index
    %c0_4 = arith.constant 0 : index
    %2 = vector.load %arg4[%c0_3, %c0_4] : memref<32x16xf32, #tpu.memory_space<vmem>>, vector<32x16xf32>
    %c0_5 = arith.constant 0 : index
    %c0_6 = arith.constant 0 : index
    %3 = vector.load %arg5[%c0_5, %c0_6] : memref<32x1xf32, #tpu.memory_space<vmem>>, vector<32x1xf32>
    %c0_7 = arith.constant 0 : index
    %c0_8 = arith.constant 0 : index
    %4 = vector.load %arg6[%c0_7, %c0_8] : memref<2x32xf32, #tpu.memory_space<vmem>>, vector<2x32xf32>
    %c0_9 = arith.constant 0 : index
    %c0_10 = arith.constant 0 : index
    %5 = vector.load %arg7[%c0_9, %c0_10] : memref<2x1xf32, #tpu.memory_space<vmem>>, vector<2x1xf32>
    %c0_i32 = arith.constant 0 : i32
    %6 = tpu.assume_multiple %c0_i32, 128 : i32
    %c0_11 = arith.constant 0 : index
    %7 = arith.index_cast %6 : i32 to index
    %8 = vector.load %arg1[%c0_11, %7] : memref<2x128xf32, #tpu.memory_space<vmem>>, vector<2x128xf32>
    %cst = arith.constant dense<0.000000e+00> : vector<16x128xf32>
    %9 = tpu.matmul %0, %8, %cst {dimension_numbers = #tpu.dot_dimension_numbers<[1], [0], [0], [1], [0, 0, 1, 1], [], []>} : vector<16x2xf32>, vector<2x128xf32>, vector<16x128xf32> -> vector<16x128xf32>
    %10 = vector.broadcast %1 : vector<16x1xf32> to vector<16x128xf32>
    %11 = arith.addf %9, %10 : vector<16x128xf32>
    %cst_12 = arith.constant 0.000000e+00 : f32
    %12 = vector.broadcast %cst_12 : f32 to vector<16x128xf32>
    %13 = arith.maximumf %11, %12 : vector<16x128xf32>
    %cst_13 = arith.constant dense<0.000000e+00> : vector<32x128xf32>
    %14 = tpu.matmul %2, %13, %cst_13 {dimension_numbers = #tpu.dot_dimension_numbers<[1], [0], [0], [1], [0, 0, 1, 1], [], []>} : vector<32x16xf32>, vector<16x128xf32>, vector<32x128xf32> -> vector<32x128xf32>
    %15 = vector.broadcast %3 : vector<32x1xf32> to vector<32x128xf32>
    %16 = arith.addf %14, %15 : vector<32x128xf32>
    %cst_14 = arith.constant 0.000000e+00 : f32
    %17 = vector.broadcast %cst_14 : f32 to vector<32x128xf32>
    %18 = arith.maximumf %16, %17 : vector<32x128xf32>
    %cst_15 = arith.constant dense<0.000000e+00> : vector<2x128xf32>
    %19 = tpu.matmul %4, %18, %cst_15 {dimension_numbers = #tpu.dot_dimension_numbers<[1], [0], [0], [1], [0, 0, 1, 1], [], []>} : vector<2x32xf32>, vector<32x128xf32>, vector<2x128xf32> -> vector<2x128xf32>
    %20 = vector.broadcast %5 : vector<2x1xf32> to vector<2x128xf32>
    %21 = arith.addf %19, %20 : vector<2x128xf32>
    %cst_16 = arith.constant 0.000000e+00 : f32
    %22 = vector.broadcast %cst_16 : f32 to vector<2x128xf32>
    %23 = arith.maximumf %21, %22 : vector<2x128xf32>
    %c0_17 = arith.constant 0 : index
    %24 = arith.index_cast %6 : i32 to index
    %25 = vector.load %arg8[%c0_17, %24] : memref<2x128xf32, #tpu.memory_space<vmem>>, vector<2x128xf32>
    tpu.vector_store %arg8[%c0_17, %24], %23 {strides = array<i32>} : memref<2x128xf32, #tpu.memory_space<vmem>>, vector<2x128xf32>,
    return
  }
  func.func @transform_0(%arg0: i32) -> (i32, i32) {
    %c0_i32 = arith.constant 0 : i32
    %c0_i32_0 = arith.constant 0 : i32
    return %c0_i32, %arg0 : i32, i32
  }
  func.func @transform_1(%arg0: i32) -> (i32, i32) {
    %c0_i32 = arith.constant 0 : i32
    %c0_i32_0 = arith.constant 0 : i32
    %c0_i32_1 = arith.constant 0 : i32
    return %c0_i32, %c0_i32_0 : i32, i32
  }
  func.func @transform_2(%arg0: i32) -> (i32, i32) {
    %c0_i32 = arith.constant 0 : i32
    %c0_i32_0 = arith.constant 0 : i32
    %c0_i32_1 = arith.constant 0 : i32
    return %c0_i32, %c0_i32_0 : i32, i32
  }
  func.func @transform_3(%arg0: i32) -> (i32, i32) {
    %c0_i32 = arith.constant 0 : i32
    %c0_i32_0 = arith.constant 0 : i32
    %c0_i32_1 = arith.constant 0 : i32
    return %c0_i32, %c0_i32_0 : i32, i32
  }
  func.func @transform_4(%arg0: i32) -> (i32, i32) {
    %c0_i32 = arith.constant 0 : i32
    %c0_i32_0 = arith.constant 0 : i32
    %c0_i32_1 = arith.constant 0 : i32
    return %c0_i32, %c0_i32_0 : i32, i32
  }
  func.func @transform_5(%arg0: i32) -> (i32, i32) {
    %c0_i32 = arith.constant 0 : i32
    %c0_i32_0 = arith.constant 0 : i32
    %c0_i32_1 = arith.constant 0 : i32
    return %c0_i32, %c0_i32_0 : i32, i32
  }
  func.func @transform_6(%arg0: i32) -> (i32, i32) {
    %c0_i32 = arith.constant 0 : i32
    %c0_i32_0 = arith.constant 0 : i32
    %c0_i32_1 = arith.constant 0 : i32
    return %c0_i32, %c0_i32_0 : i32, i32
  }
  func.func @transform_7(%arg0: i32) -> (i32, i32) {
    %c0_i32 = arith.constant 0 : i32
    %c0_i32_0 = arith.constant 0 : i32
    return %c0_i32, %arg0 : i32, i32
  }
}

</mosaic_0001>

<bundles_post_ra>
// kernel: tpu_custom_call.1
= control target key start
LH: loop header
LB: loop body
LE: loop exit
PB: predicated region body
PF: predicated region fallthrough
CT: control target
= control target key end

     0   :  { %12 = vsyncpa [#allocation3], 0  ;;  %s1006_s0 = inlined_call_operand.vmem [shape: f32[2,256], index: 0, kind: input, shape index: {}]   ;;  %s1007_s1 = inlined_call_operand.vmem [shape: f32[16,2], index: 1, kind: input, shape index: {}]   ;;  %s1008_s2 = inlined_call_operand.vmem [shape: f32[16,1], index: 2, kind: input, shape index: {}]   ;;  %s1009_s3 = inlined_call_operand.vmem [shape: f32[32,16], index: 3, kind: input, shape index: {}]   ;;  %s1010_s4 = inlined_call_operand.vmem [shape: f32[32,1], index: 4, kind: input, shape index: {}]   ;;  %s1011_s5 = inlined_call_operand.vmem [shape: f32[2,32], index: 5, kind: input, shape index: {}]   ;;  %s1012_s6 = inlined_call_operand.vmem [shape: f32[2,1], index: 6, kind: input, shape index: {}]   ;;  %s1013_s7 = inlined_call_operand.hbm [shape: f32[2,256], index: 7, kind: output, shape index: {}]  }
   0x1   :  { %14 = vsyncpa [#allocation3 + $0x1], 0  ;;  %s871_s24 = smov 0   ;;  %s873_s25 = smov 0  }
   0x2   :  { %s875_s26 = smov 0   ;;  %s877_s27 = smov 0  }
   0x3 LB: > { %s892_s28 = sadd.s32 4294967295, %s825_s27   ;;  %s663_s29 = sadd.s32 4294967294, %s825_s27   ;;  %s825_s27 = sphi %s877_s27, %s1019_s27   ;;  %s821_s26 = sphi %s875_s26, %s1018_s26   ;;  %s817_s25 = sphi %s873_s25, %s1017_s25   ;;  %s813_s24 = sphi %s871_s24, %s1016_s24  }
   0x4   : > { %s896_s30 = sadd.s32 1, %s825_s27   ;;  %s179_s8 = sadd.s32 1, %s821_s26 }
   0x5   : > { %s176_s9 = ssub.s32 %s825_s27, %s896_s30  ;;  %p189_p0 = scmp.ne.s32.totalorder %s821_s26, %s817_s25 }
   0x6   : > { %p177_p1 = scmp.eq.s32.totalorder %s176_s9, 0  ;;  %p190_p2 = scmp.eq.s32.totalorder %s892_s28, 1 }
   0x7   : > { %p195_p3 = scmp.ne.s32.totalorder %s817_s25, %s813_s24  ;;  %p196_p4 = scmp.eq.s32.totalorder %s663_s29, 1 }
   0x8   : > { %s907_s10 = scalar_select %p177_p1, %s821_s26, %s179_s8  }
   0x9   : > { %p909_p5 = por %p190_p2, %p189_p0  ;;  %p913_p6 = por %p196_p4, %p195_p3 }
   0xa   : > { %p666_p7 = scmp.ge.s32.totalorder %s825_s27, 1  ;;  %p239_p8 = scmp.lt.s32.totalorder %s825_s27, 3 }
   0xc   : > { %p240_p9 = pnand %p666_p7, %p239_p8 }
   0xd   : > { %p270_p10 = scmp.lt.s32.totalorder (!%p240_p9), %s892_s28, 1  ;;  %s267_s18 = sand.u32 (!%p240_p9), 1, %s817_s25  }
   0xe   : > { %243 = sbr.rel (%p240_p9) target bundleno = 645 (0x285), region = 48  ;;  %s667_s19 = sshll.u32 (!%p240_p9), %s267_s18, 1 }
   0xf   : > { %s269_s21 = scalar_lea.vmem (!%p240_p9), [#allocation2], %s667_s19  ;;  %s591_s9 = scalar_lea.sflag (!%p240_p9), [#allocation3], %s267_s18 }
  0x10   : > { %s604_s22 = sshll.u32 (!%p240_p9), %s269_s21, 4  ;;  %s830_s14 = smov (!%p240_p9), [#allocation2]   ;;  %s605_s22 = int_to_ptr.vmem [resolvable:$true] %s604_s22 }
  0x11   : > { %s765_s13 = scalar_lea.vmem (!%p240_p9), %s605_s22, 32  ;;  %s769_s15 = sshll.u32 (!%p240_p9), %s830_s14, 4  ;;  %s770_s15 = int_to_ptr.vmem [resolvable:$false] %s769_s15 }
  0x12   : > { %p766_p11 = scmp.ne.s32.totalorder (!%p240_p9), %s605_s22, %s765_s13  ;;  %p772_p0 = scmp.lt.s32.totalorder (!%p240_p9), %s605_s22, %s770_s15 }
  0x13   : > { %v274_v0 = vld [vmem:[%s1007_s1] sm:$0xff]  ;;  %vm299_vm0 = vcmask 15360   ;;  %v827_v1 = vmov 0   ;;  %v277_v2 = vld [vmem:[%s1008_s2 + $0x8] sm:$0xff]  ;;  %s271_s17 = scalar_select %p270_p10, %s892_s28, 1  ;;  %vm306_vm1 = vcmask 1041408  }
  0x14   : > { %697 = vmatprep.mubr.msk.f32.mxu0 %vm299_vm0, %v274_v0  ;;  %763 = vset.pattern.permute.xlu0 %v827_v1  ;;  %v276_v3 = vld [vmem:[%s1008_s2] sm:$0xff]  ;;  %v275_v5 = vld [vmem:[%s1007_s1 + $0x8] sm:$0xff]  ;;  %vm407_vm2 = vcmask 130048   ;;  %v285_v9 = vld [vmem:[%s1010_s4 + $0x18] sm:$0xff]  ;;  %v828_v23 = vmov 0.0   ;;  %vm829_vm3 = vmmov 0   ;;  %p767_p12 = pnand %p766_p11, %p909_p5 }
  0x15   : > { %296 = vperm.xlu0 %763, %v277_v2   ;;  %764 = vset.pattern.permute.xlu1 %v827_v1  ;;  %s668_s20 = sshll.u32 %s271_s17, 1  ;;  %v283_v6 = vld [vmem:[%s1010_s4 + $0x8] sm:$0xff]  ;;  %v287_v7 = vld [vmem:[%s1012_s6] sm:$0x3]  ;;  %v284_v10 = vld [vmem:[%s1010_s4 + $0x10] sm:$0xff]  ;;  %vm514_vm4 = vcmask 261120  }
  0x16   : > { %s273_s23 = scalar_lea.vmem %s1006_s0, %s668_s20  ;;  %v278_v8 = vld [vmem:[%s1009_s3] sm:$0xff]  ;;  %404 = vperm.xlu1 %764, %v285_v9   ;;  %v279_v20 = vld [vmem:[%s1009_s3 + $0x8] sm:$0xff]  ;;  %v280_v21 = vld [vmem:[%s1009_s3 + $0x10] sm:$0xff]  ;;  %s678_s20 = sshll.u32 %s892_s28, 5 }
  0x17   : > { %v288_v4 = vld [vmem:[%s273_s23] sm:$0x3]  ;;  %704 = vmatprep.mubr.msk.f32.mxu1 %vm407_vm2, %v278_v8  ;;  %v281_v22 = vld [vmem:[%s1009_s3 + $0x18] sm:$0xff]  ;;  %s602_s8 = scalar_lea.hbm %s1013_s7, %s678_s20  ;;  %p768_p13 = pneg %p767_p12 }
  0x18   : > { %695 = vmatprep.subr.msk.mxu0 %vm306_vm1, %v288_v4  ;;  %v282_v11 = vld [vmem:[%s1010_s4] sm:$0xff]  ;;  %s771_s28 = scalar_lea.vmem %s770_s15, 64 }
  0x19   : > { %291 = vperm.xlu0 %763, %v276_v3   ;;  %696 = vmatpush3.msk.msra.mxu0 %vm306_vm1, %v288_v4  ;;  %v286_v40 = vld [vmem:[%s1011_s5] sm:$0x3]  ;;  %p773_p1 = scmp.lt.s32.totalorder %s771_s28, %s765_s13 }
  0x1a   : > { %698 = vmatmul.mubr.msk.f32.vlgmr.msra.gmra.mxu0 %vm299_vm0, %v275_v5  ;;  %399 = vperm.xlu1 %764, %v284_v10  }
  0x1b   : > { %710 = vmatprep.subr.mxu0 %v828_v23  ;;  %718 = vmatprep.mubr.msk.f32.mxu0 %vm829_vm3, %v828_v23  ;;  %p774_p2 = por %p773_p1, %p772_p0 }
  0x1d   : > { %394 = vperm.xlu0 %763, %v283_v6   ;;  %p775_p3 = pnand %p774_p2, %p768_p13 }
  0x1e   : > { %389 = vperm.xlu1 %764, %v282_v11  }
  0x21   : > { %511 = vperm.xlu0 %763, %v287_v7  }
  0x90   : > { %v297_v12 = vpop.permute.xlu0 %296 }
  0x91   : > { %v405_v24 = vpop.permute.xlu1 %404 }
  0x94   : > { %v292_v15 = vpop.permute.xlu0 %291 }
  0x95   : > { %v400_v25 = vpop.permute.xlu1 %399 }
  0x98   : > { %v395_v29 = vpop.permute.xlu0 %394 }
  0x99   : > { %v390_v31 = vpop.permute.xlu1 %389 }
  0x9c   : > { %v512_v41 = vpop.permute.xlu0 %511 }
  0xda   : > { %v699_v13 = vpop.f32.mrf.mxu0 }
  0xdb   : > { %v382_v14 = vadd.f32 %v699_v13, %v297_v12 }
  0xdc   : > { %v376_v16 = vpop.f32.mrf.mxu0 }
  0xdd   : > { %v386_v17 = vmax.f32 %v382_v14, 0.0  ;;  %v377_v18 = vadd.f32 %v376_v16, %v292_v15 }
  0xdf   : > { %v385_v19 = vmax.f32 %v377_v18, 0.0  ;;  %700 = vmatprep.subr.mxu1 %v386_v17 }
  0xe0   : > { %701 = vmatpush3.msra.mxu1 %v386_v17 }
  0xe1   : > { %702 = vmatprep.subr.mxu1 %v385_v19 }
  0xe2   : > { %703 = vmatpush3.msra.mxu1 %v385_v19 }
  0xe3   : > { %705 = vmatmul.mubr.msk.f32.vlgmr.msra.gmra.mxu1 %vm407_vm2, %v279_v20 }
  0xe4   : > { %707 = vmatprep.mubr.msk.f32.mxu1 %vm407_vm2, %v280_v21 }
  0xe7   : > { %708 = vmatmul.mubr.msk.f32.gmra.mxu1 %vm407_vm2, %v281_v22 }
 0x1a3   : > { %v706_v26 = vpop.f32.mrf.mxu1 }
 0x1a4   : > { %v492_v33 = vadd.f32 %v706_v26, %v395_v29 }
 0x1a5   : > { %v486_v27 = vpop.f32.mrf.mxu1 }
 0x1a6   : > { %v487_v36 = vadd.f32 %v486_v27, %v390_v31  ;;  %v506_v38 = vmax.f32 %v492_v33, 0.0 }
 0x1a7   : > { %v709_v28 = vpop.f32.mrf.mxu1 }
 0x1a8   : > { %v502_v30 = vadd.f32 %v709_v28, %v405_v24  ;;  %v505_v39 = vmax.f32 %v487_v36, 0.0 }
 0x1a9   : > { %v496_v32 = vpop.f32.mrf.mxu1 }
 0x1aa   : > { %v508_v34 = vmax.f32 %v502_v30, 0.0  ;;  %v497_v35 = vadd.f32 %v496_v32, %v400_v25 }
 0x1ac   : > { %v507_v37 = vmax.f32 %v497_v35, 0.0  ;;  %711 = vmatpush3.msra.mxu0 %v508_v34 }
 0x1ad   : > { %712 = vmatprep.subr.mxu0 %v828_v23 }
 0x1ae   : > { %713 = vmatpush3.msra.mxu0 %v507_v37 }
 0x1af   : > { %714 = vmatprep.subr.mxu0 %v828_v23 }
 0x1b0   : > { %715 = vmatpush3.msra.mxu0 %v506_v38 }
 0x1b1   : > { %716 = vmatprep.subr.mxu0 %v828_v23 }
 0x1b2   : > { %717 = vmatpush3.msra.mxu0 %v505_v39 }
 0x1b3   : > { %719 = vmatmul.mubr.msk.f32.vlgmr.msra.gmra.mxu0 %vm514_vm4, %v286_v40 }
 0x273   : > { %v584_v42 = vpop.f32.mrf.mxu0 }
 0x274   : > { %v585_v43 = vadd.f32 %v584_v42, %v512_v41 }
 0x275   : > { %v720_v44 = vpop.f32.mrf.mxu0 }
 0x276   : > { %v588_v45 = vmax.f32 %v585_v43, 0.0 }
 0x278   : > { %589 = vst [vmem:[%s269_s21] sm:$0x3] %v588_v45 }
 0x279   : > { %778 = shalt.err (!%p775_p3)
}
 0x27a   : > { %s779_s16 = scalar_lea.hbm %s602_s8, 32  ;;  %s783_s19 = scalar_lea.hbm %s1013_s7, 64 }
 0x27b   : > { %p780_p4 = scmp.ne.s32.totalorder %s602_s8, %s779_s16  ;;  %p784_p9 = scmp.lt.s32.totalorder %s602_s8, %s1013_s7 }
 0x27c   : > { %p785_p10 = scmp.lt.s32.totalorder %s783_s19, %s779_s16 }
 0x27d   : > { %p781_p7 = pnand %p780_p4, %p909_p5 }
 0x27e   : > { %p786_p11 = por %p785_p10, %p784_p9 }
 0x27f   : > { %p782_p8 = pneg %p781_p7 }
 0x281   : > { %p787_p12 = pnand %p786_p11, %p782_p8 }
 0x283   : > { %790 = shalt.err (!%p787_p12)
}
 0x284   : > { %721 = dma.vmem_to_hbm [thread:$0]  (%p909_p5), %s605_s22, 32, %s602_s8, %s591_s9  }
 0x285 PF: > { %p727_p13 = scmp.ge.s32.totalorder %s825_s27, 2  ;;  %s616_s23 = sand.u32 1, %s813_s24  }
 0x286   : > { %s617_s29 = scalar_lea.sflag [#allocation3], %s616_s23 }
 0x287   : > { %p724_p0 = pnand %p727_p13, %p913_p6 }
 0x289   : > { %p725_p1 = pneg %p724_p0 }
 0x28b   : > { %808 = dma.done.wait (%p725_p1), %s617_s29, 32  }
 0x28c   : > { %810 = vsyncadd (%p725_p1), %s617_s29, 4294967264  ;;  %p17_p2 = scmp.ge.s32.totalorder %s896_s30, 4   ;;  %s1016_s24 = smov %s817_s25 }
 0x28d   : > { %s1017_s25 = smov %s821_s26  ;;  %s1018_s26 = smov %s907_s10 }
 0x28e   : > { %s1019_s27 = smov %s896_s30  ;;  %19 = sbr.rel (!%p17_p2) target bundleno = 3 (0x3), region = 83 }
 0x293   :  { %622 = vsyncpa [#allocation3], 1 }
 0x294   :  { %624 = vsyncpa [#allocation3 + $0x1], 1 }

</bundles_post_ra>
